<compile_context>
chip_gen: v5e
topology: v5e:2x2
jax: 0.10.0
libtpu: 0.0.40
codegen_flags: <defaults>
</compile_context>

<pallas_src>
import jax
import jax.numpy as jnp
from jax.experimental import pallas as pl
from jax.experimental.pallas import tpu as pltpu

# ---- problem sizes (small, consistent with the module's forward) ----
N = 64    # number of nodes / stocks
E = 32    # input embedding size (input_size)
H = 32    # hidden_size
NEG_SLOPE = 0.01  # nn.LeakyReLU default

assert E == H, "slab packing below assumes input_size == hidden_size"


def glstm_kernel(adj_ref, slab_ref, wroot_ref, wrel_ref, brel_ref,
                 wgate_ref, wn_ref, out_ref):
    f32 = jnp.float32
    adj = adj_ref[...]          # (N, N)
    slab = slab_ref[...]        # (N, 4H) = [h | x | h_t | c], lane-dense

    # --- GNN (RGCN, single relation, no attention) ---
    # adj @ slab yields adj@h in lanes [0:H); the extra output lanes are
    # essentially free on the MXU and keep the product lane-dense.  The
    # zero-padded (4H, H) weights select h / adj@h with K=128 contractions.
    agg_slab = jnp.dot(adj, slab, preferred_element_type=f32)          # (N, 4H)
    hn = (jnp.dot(slab, wroot_ref[...], preferred_element_type=f32)
          + jnp.dot(agg_slab, wrel_ref[...], preferred_element_type=f32)
          + brel_ref[...])                                             # (N, H)
    hn = jnp.where(hn > 0, hn, NEG_SLOPE * hn)                         # LeakyReLU

    # --- gates (column blocks ordered [i, f, o, t, u]) ---
    gates = (jnp.dot(slab, wgate_ref[...], preferred_element_type=f32)
             + jnp.dot(hn, wn_ref[...], preferred_element_type=f32))   # (N, 5H)

    sig = jax.nn.sigmoid(gates[:, :4 * H])       # one full-width (128-lane) sigmoid
    i_s = sig[:, 0 * H:1 * H]
    f_s = sig[:, 1 * H:2 * H]
    o_s = sig[:, 2 * H:3 * H]
    t_s = sig[:, 3 * H:4 * H]
    u_t = jnp.tanh(gates[:, 4 * H:5 * H])

    h_t = slab[:, 2 * H:3 * H]
    c = slab[:, 3 * H:4 * H]

    new_c = f_s * c + i_s * u_t + t_s * h_t
    new_h = o_s * jnp.tanh(new_c)

    out_ref[...] = jnp.concatenate([new_h, new_c], axis=-1)            # (N, 2H)


def pack_params(params):
    """One-time repack of PyTorch-style (out, in) weights into kernel layout."""
    # gate block order [i, f, o, u, t] (PyTorch split order) -> [i, f, o, t, u]
    perm = jnp.concatenate([jnp.arange(0, 3 * H),
                            jnp.arange(4 * H, 5 * H),
                            jnp.arange(3 * H, 4 * H)])

    def gate_t(w):                        # (5H, in) -> (in, 5H), permuted columns
        return w.T[:, perm]

    wgate = jnp.zeros((4 * H, 5 * H), jnp.float32)
    wgate = wgate.at[0 * H:1 * H].set(gate_t(params["Wh"]))   # h rows of the slab
    wgate = wgate.at[1 * H:2 * H].set(gate_t(params["U"]))    # x rows
    wgate = wgate.at[2 * H:3 * H].set(gate_t(params["Wt"]))   # h_t rows
    # rows [3H, 4H) stay zero: c occupies those slab lanes but has no gate weight

    wroot = jnp.zeros((4 * H, H), jnp.float32).at[0:H].set(params["w_root"].T)
    wrel = jnp.zeros((4 * H, H), jnp.float32).at[0:H].set(params["w_rel"].T)

    return {
        "wroot": wroot,                        # (4H, H)
        "wrel": wrel,                          # (4H, H)
        "brel": params["b_rel"].reshape(1, H),
        "wgate": wgate,                        # (4H, 5H)
        "wn": gate_t(params["Wn"]),            # (H, 5H)
    }


@jax.jit
def glstm_cell_forward(x, h, c, h_t, adj, packed):
    """Lane-dense packing + single pallas_call; no per-call weight transposes."""
    slab = jnp.concatenate([h, x, h_t, c], axis=-1)      # (N, 4H) = (64, 128)
    vmem = pl.BlockSpec(memory_space=pltpu.MemorySpace.VMEM)
    out = pl.pallas_call(
        glstm_kernel,
        out_shape=jax.ShapeDtypeStruct((N, 2 * H), jnp.float32),
        in_specs=[vmem] * 7,
        out_specs=vmem,
    )(adj, slab, packed["wroot"], packed["wrel"], packed["brel"],
      packed["wgate"], packed["wn"])
    return out[:, :H], out[:, H:]


def glstm_cell_reference(x, h, c, h_t, adj, params):
    """Pure-JAX reference mirroring the PyTorch forward (for verification)."""
    agg = adj @ h
    hn = h @ params["w_root"].T + agg @ params["w_rel"].T + params["b_rel"]
    hn = jnp.where(hn > 0, hn, NEG_SLOPE * hn)
    gates = (h @ params["Wh"].T + x @ params["U"].T
             + hn @ params["Wn"].T + h_t @ params["Wt"].T)
    i_g, f_g, o_g, u_g, t_g = jnp.split(gates, 5, axis=-1)
    new_c = (jax.nn.sigmoid(f_g) * c + jax.nn.sigmoid(i_g) * jnp.tanh(u_g)
             + jax.nn.sigmoid(t_g) * h_t)
    new_h = jax.nn.sigmoid(o_g) * jnp.tanh(new_c)
    return new_h, new_c


def init_params(key):
    ks = jax.random.split(key, 8)
    s = 0.1
    return {
        # RGCN (relation_num=1): lin_root (no bias), lin_rel (bias)
        "w_root": s * jax.random.normal(ks[0], (H, H), jnp.float32),
        "w_rel":  s * jax.random.normal(ks[1], (H, H), jnp.float32),
        "b_rel":  s * jax.random.normal(ks[2], (H,), jnp.float32),
        # GLSTMCell gate projections (all bias=False in the module)
        "Wh": s * jax.random.normal(ks[3], (5 * H, H), jnp.float32),
        "Wn": s * jax.random.normal(ks[4], (5 * H, H), jnp.float32),  # num_heads=1
        "Wt": s * jax.random.normal(ks[5], (5 * H, H), jnp.float32),
        "U":  s * jax.random.normal(ks[6], (5 * H, E), jnp.float32),
        # V is defined in __init__ but unused in forward; omitted.
    }


if __name__ == "__main__":
    key = jax.random.PRNGKey(0)
    kx, kh, kc, kht, kadj, kp = jax.random.split(key, 6)

    x = jax.random.normal(kx, (N, E), jnp.float32)
    h = jax.random.normal(kh, (N, H), jnp.float32)
    c = jax.random.normal(kc, (N, H), jnp.float32)
    h_t = jax.random.normal(kht, (N, H), jnp.float32)
    # binary-ish adjacency (relation 0 of adjs with relation_num=1)
    adj = (jax.random.uniform(kadj, (N, N)) < 0.1).astype(jnp.float32)

    params = init_params(kp)
    packed = pack_params(params)       # one-time weight repack (no per-call .T)

    new_h, new_c = glstm_cell_forward(x, h, c, h_t, adj, packed)
    jax.block_until_ready((new_h, new_c))

    ref_h, ref_c = glstm_cell_reference(x, h, c, h_t, adj, params)
    assert jnp.allclose(new_h, ref_h, atol=1e-4, rtol=1e-4)
    assert jnp.allclose(new_c, ref_c, atol=1e-4, rtol=1e-4)

    print("KERNEL_OK")
</pallas_src>

<mosaic_0001>
module attributes {stable_mosaic.version = 11 : i64} {
  func.func @glstm_kernel(%arg0: memref<64x64xf32, #tpu.memory_space<vmem>>, %arg1: memref<64x128xf32, #tpu.memory_space<vmem>>, %arg2: memref<128x32xf32, #tpu.memory_space<vmem>>, %arg3: memref<128x32xf32, #tpu.memory_space<vmem>>, %arg4: memref<1x32xf32, #tpu.memory_space<vmem>>, %arg5: memref<128x160xf32, #tpu.memory_space<vmem>>, %arg6: memref<32x160xf32, #tpu.memory_space<vmem>>, %arg7: memref<64x64xf32, #tpu.memory_space<vmem>>) attributes {dimension_semantics = [], scalar_prefetch = 0 : i64, scratch_operands = 0 : i64, tpu.core_type = #tpu.core_type<tc>} {
    %c0 = arith.constant 0 : index
    %c0_0 = arith.constant 0 : index
    %0 = vector.load %arg0[%c0, %c0_0] : memref<64x64xf32, #tpu.memory_space<vmem>>, vector<64x64xf32>
    %c0_1 = arith.constant 0 : index
    %c0_2 = arith.constant 0 : index
    %1 = vector.load %arg1[%c0_1, %c0_2] : memref<64x128xf32, #tpu.memory_space<vmem>>, vector<64x128xf32>
    %cst = arith.constant dense<0.000000e+00> : vector<64x128xf32>
    %2 = tpu.matmul %0, %1, %cst {dimension_numbers = #tpu.dot_dimension_numbers<[1], [0], [0], [1], [0, 0, 1, 1], [], []>} : vector<64x64xf32>, vector<64x128xf32>, vector<64x128xf32> -> vector<64x128xf32>
    %c0_3 = arith.constant 0 : index
    %c0_4 = arith.constant 0 : index
    %3 = vector.load %arg2[%c0_3, %c0_4] : memref<128x32xf32, #tpu.memory_space<vmem>>, vector<128x32xf32>
    %cst_5 = arith.constant dense<0.000000e+00> : vector<64x32xf32>
    %4 = tpu.matmul %1, %3, %cst_5 {dimension_numbers = #tpu.dot_dimension_numbers<[1], [0], [0], [1], [0, 0, 1, 1], [], []>} : vector<64x128xf32>, vector<128x32xf32>, vector<64x32xf32> -> vector<64x32xf32>
    %c0_6 = arith.constant 0 : index
    %c0_7 = arith.constant 0 : index
    %5 = vector.load %arg3[%c0_6, %c0_7] : memref<128x32xf32, #tpu.memory_space<vmem>>, vector<128x32xf32>
    %cst_8 = arith.constant dense<0.000000e+00> : vector<64x32xf32>
    %6 = tpu.matmul %2, %5, %cst_8 {dimension_numbers = #tpu.dot_dimension_numbers<[1], [0], [0], [1], [0, 0, 1, 1], [], []>} : vector<64x128xf32>, vector<128x32xf32>, vector<64x32xf32> -> vector<64x32xf32>
    %7 = arith.addf %4, %6 : vector<64x32xf32>
    %c0_9 = arith.constant 0 : index
    %c0_10 = arith.constant 0 : index
    %8 = vector.load %arg4[%c0_9, %c0_10] : memref<1x32xf32, #tpu.memory_space<vmem>>, vector<1x32xf32>
    %9 = vector.broadcast %8 : vector<1x32xf32> to vector<64x32xf32>
    %10 = arith.addf %7, %9 : vector<64x32xf32>
    %cst_11 = arith.constant 0.000000e+00 : f32
    %11 = vector.broadcast %cst_11 : f32 to vector<64x32xf32>
    %12 = arith.cmpf ogt, %10, %11 : vector<64x32xf32>
    %cst_12 = arith.constant 0.00999999977 : f32
    %13 = vector.broadcast %cst_12 : f32 to vector<64x32xf32>
    %14 = arith.mulf %13, %10 : vector<64x32xf32>
    %15 = arith.select %12, %10, %14 : vector<64x32xi1>, vector<64x32xf32>
    %c0_13 = arith.constant 0 : index
    %c0_14 = arith.constant 0 : index
    %16 = vector.load %arg5[%c0_13, %c0_14] : memref<128x160xf32, #tpu.memory_space<vmem>>, vector<128x160xf32>
    %cst_15 = arith.constant dense<0.000000e+00> : vector<64x160xf32>
    %17 = tpu.matmul %1, %16, %cst_15 {dimension_numbers = #tpu.dot_dimension_numbers<[1], [0], [0], [1], [0, 0, 1, 1], [], []>} : vector<64x128xf32>, vector<128x160xf32>, vector<64x160xf32> -> vector<64x160xf32>
    %c0_16 = arith.constant 0 : index
    %c0_17 = arith.constant 0 : index
    %18 = vector.load %arg6[%c0_16, %c0_17] : memref<32x160xf32, #tpu.memory_space<vmem>>, vector<32x160xf32>
    %cst_18 = arith.constant dense<0.000000e+00> : vector<64x160xf32>
    %19 = tpu.matmul %15, %18, %cst_18 {dimension_numbers = #tpu.dot_dimension_numbers<[1], [0], [0], [1], [0, 0, 1, 1], [], []>} : vector<64x32xf32>, vector<32x160xf32>, vector<64x160xf32> -> vector<64x160xf32>
    %20 = arith.addf %17, %19 : vector<64x160xf32>
    %21 = vector.extract_strided_slice %20 {offsets = [0, 0], sizes = [64, 128], strides = [1, 1]} : vector<64x160xf32> to vector<64x128xf32>
    %22 = arith.negf %21 : vector<64x128xf32>
    %23 = math.exp %22 : vector<64x128xf32>
    %cst_19 = arith.constant 1.000000e+00 : f32
    %24 = vector.broadcast %cst_19 : f32 to vector<64x128xf32>
    %25 = arith.addf %24, %23 : vector<64x128xf32>
    %26 = arith.divf %24, %25 : vector<64x128xf32>
    %27 = vector.extract_strided_slice %26 {offsets = [0, 0], sizes = [64, 32], strides = [1, 1]} : vector<64x128xf32> to vector<64x32xf32>
    %28 = vector.extract_strided_slice %26 {offsets = [0, 32], sizes = [64, 32], strides = [1, 1]} : vector<64x128xf32> to vector<64x32xf32>
    %29 = vector.extract_strided_slice %26 {offsets = [0, 64], sizes = [64, 32], strides = [1, 1]} : vector<64x128xf32> to vector<64x32xf32>
    %30 = vector.extract_strided_slice %26 {offsets = [0, 96], sizes = [64, 32], strides = [1, 1]} : vector<64x128xf32> to vector<64x32xf32>
    %31 = vector.extract_strided_slice %20 {offsets = [0, 128], sizes = [64, 32], strides = [1, 1]} : vector<64x160xf32> to vector<64x32xf32>
    %32 = math.tanh %31 : vector<64x32xf32>
    %33 = vector.extract_strided_slice %1 {offsets = [0, 64], sizes = [64, 32], strides = [1, 1]} : vector<64x128xf32> to vector<64x32xf32>
    %34 = vector.extract_strided_slice %1 {offsets = [0, 96], sizes = [64, 32], strides = [1, 1]} : vector<64x128xf32> to vector<64x32xf32>
    %35 = arith.mulf %28, %34 : vector<64x32xf32>
    %36 = arith.mulf %27, %32 : vector<64x32xf32>
    %37 = arith.addf %35, %36 : vector<64x32xf32>
    %38 = arith.mulf %30, %33 : vector<64x32xf32>
    %39 = arith.addf %37, %38 : vector<64x32xf32>
    %40 = math.tanh %39 : vector<64x32xf32>
    %41 = arith.mulf %29, %40 : vector<64x32xf32>
    %42 = tpu.concatenate %41, %39 in 1 : vector<64x32xf32>, vector<64x32xf32> -> vector<64x64xf32>
    %c0_20 = arith.constant 0 : index
    %c0_21 = arith.constant 0 : index
    %43 = vector.load %arg7[%c0_20, %c0_21] : memref<64x64xf32, #tpu.memory_space<vmem>>, vector<64x64xf32>
    tpu.vector_store %arg7[%c0_20, %c0_21], %42 {strides = array<i32>} : memref<64x64xf32, #tpu.memory_space<vmem>>, vector<64x64xf32>,
    return
  }
}

</mosaic_0001>

<bundles_post_ra>
// kernel: glstm_cell_forward.1
= control target key start
LH: loop header
LB: loop body
LE: loop exit
PB: predicated region body
PF: predicated region fallthrough
CT: control target
= control target key end

     0   :  { %vm42_vm0 = vcmask 523264   ;;  %vm298_vm2 = vcmask 261120   ;;  %s1620_s1 = inlined_call_operand.vmem [shape: f32[64,128], index: 1, kind: input, shape index: {}]   ;;  %s1621_s0 = inlined_call_operand.vmem [shape: f32[64,64], index: 0, kind: input, shape index: {}]   ;;  %s1622_s3 = inlined_call_operand.vmem [shape: f32[128,32], index: 3, kind: input, shape index: {}]   ;;  %s1623_s2 = inlined_call_operand.vmem [shape: f32[128,32], index: 2, kind: input, shape index: {}]   ;;  %s1624_s4 = inlined_call_operand.vmem [shape: f32[1,32], index: 4, kind: input, shape index: {}]   ;;  %s1625_s5 = inlined_call_operand.vmem [shape: f32[128,160], index: 5, kind: input, shape index: {}]   ;;  %s1626_s6 = inlined_call_operand.vmem [shape: f32[32,160], index: 6, kind: input, shape index: {}]   ;;  %s1627_s7 = inlined_call_operand.vmem [shape: f32[64,64], index: 7, kind: output, shape index: {}]  }
   0x1   :  { %v1067_v0 = vld [vmem:[%s1620_s1 + $0x38] sm:$0xff]  ;;  %v1072_v1 = vld [vmem:[%s1620_s1 + $0x30] sm:$0xff]  ;;  %v1078_v2 = vld [vmem:[%s1620_s1 + $0x28] sm:$0xff] }
   0x2   :  { %75 = vmatpush.msra.mxu0 %v1067_v0  ;;  %v1084_v3 = vld [vmem:[%s1620_s1 + $0x20] sm:$0xff]  ;;  %v1090_v4 = vld [vmem:[%s1620_s1 + $0x18] sm:$0xff]  ;;  %v1096_v5 = vld [vmem:[%s1620_s1 + $0x10] sm:$0xff] }
   0x3   :  { %v1102_v6 = vld [vmem:[%s1620_s1 + $0x8] sm:$0xff]  ;;  %v1108_v7 = vld [vmem:[%s1620_s1] sm:$0xff]  ;;  %v28_v10 = vld [vmem:[%s1621_s0 + $0x10] sm:$0xff]  ;;  %s1023_s1 = smov 64  }
   0x4   :  { %76 = vmatpush.msra.mxu0 %v1072_v1  ;;  %v26_v8 = vld [vmem:[%s1621_s0] sm:$0xff]  ;;  %v27_v9 = vld [vmem:[%s1621_s0 + $0x8] sm:$0xff]  ;;  %v29_v11 = vld [vmem:[%s1621_s0 + $0x18] sm:$0xff] }
   0x5   :  { %v139_v12 = vld [vmem:[%s1622_s3 + $0x78] sm:$0xff]  ;;  %v138_v13 = vld [vmem:[%s1622_s3 + $0x70] sm:$0xff]  ;;  %v137_v14 = vld [vmem:[%s1622_s3 + $0x68] sm:$0xff] }
   0x6   :  { %77 = vmatpush.msra.mxu0 %v1078_v2  ;;  %140 = vmatpush.msra.mxu1 %v139_v12  ;;  %v136_v15 = vld [vmem:[%s1622_s3 + $0x60] sm:$0xff]  ;;  %v135_v17 = vld [vmem:[%s1622_s3 + $0x58] sm:$0xff]  ;;  %v134_v18 = vld [vmem:[%s1622_s3 + $0x50] sm:$0xff] }
   0x7   :  { %939 = vmatpush.msra.mxu2 %v139_v12  ;;  %v30_v16 = vld [vmem:[%s1621_s0 + $0x20] sm:$0xff]  ;;  %v133_v19 = vld [vmem:[%s1622_s3 + $0x48] sm:$0xff]  ;;  %v131_v22 = vld [vmem:[%s1622_s3 + $0x38] sm:$0xff] }
   0x8   :  { %78 = vmatpush.msra.mxu0 %v1084_v3  ;;  %141 = vmatpush.msra.mxu1 %v138_v13  ;;  %v132_v20 = vld [vmem:[%s1622_s3 + $0x40] sm:$0xff]  ;;  %v31_v21 = vld [vmem:[%s1621_s0 + $0x28] sm:$0xff]  ;;  %v130_v23 = vld [vmem:[%s1622_s3 + $0x30] sm:$0xff] }
   0x9   :  { %940 = vmatpush.msra.mxu2 %v138_v13  ;;  %v129_v24 = vld [vmem:[%s1622_s3 + $0x28] sm:$0xff]  ;;  %v128_v25 = vld [vmem:[%s1622_s3 + $0x20] sm:$0xff]  ;;  %v32_v26 = vld [vmem:[%s1621_s0 + $0x30] sm:$0xff] }
   0xa   :  { %79 = vmatpush.msra.mxu0 %v1090_v4  ;;  %142 = vmatpush.msra.mxu1 %v137_v14  ;;  %v127_v27 = vld [vmem:[%s1622_s3 + $0x18] sm:$0xff]  ;;  %v126_v28 = vld [vmem:[%s1622_s3 + $0x10] sm:$0xff]  ;;  %v125_v29 = vld [vmem:[%s1622_s3 + $0x8] sm:$0xff] }
   0xb   :  { %941 = vmatpush.msra.mxu2 %v137_v14  ;;  %v33_v30 = vld [vmem:[%s1621_s0 + $0x38] sm:$0xff]  ;;  %v124_v31 = vld [vmem:[%s1622_s3] sm:$0xff]  ;;  %v122_v34 = vld [vmem:[%s1623_s2 + $0x70] sm:$0xff] }
   0xc   :  { %80 = vmatpush.msra.mxu0 %v1096_v5  ;;  %143 = vmatpush.msra.mxu1 %v136_v15  ;;  %v123_v33 = vld [vmem:[%s1623_s2 + $0x78] sm:$0xff]  ;;  %v121_v35 = vld [vmem:[%s1623_s2 + $0x68] sm:$0xff]  ;;  %v120_v36 = vld [vmem:[%s1623_s2 + $0x60] sm:$0xff] }
   0xd   :  { %942 = vmatpush.msra.mxu2 %v136_v15  ;;  %v119_v38 = vld [vmem:[%s1623_s2 + $0x58] sm:$0xff]  ;;  %v118_v39 = vld [vmem:[%s1623_s2 + $0x50] sm:$0xff]  ;;  %v117_v40 = vld [vmem:[%s1623_s2 + $0x48] sm:$0xff] }
   0xe   :  { %81 = vmatpush.msra.mxu0 %v1102_v6  ;;  %144 = vmatpush.msra.mxu1 %v135_v17  ;;  %v116_v41 = vld [vmem:[%s1623_s2 + $0x40] sm:$0xff]  ;;  %v115_v43 = vld [vmem:[%s1623_s2 + $0x38] sm:$0xff]  ;;  %v114_v44 = vld [vmem:[%s1623_s2 + $0x30] sm:$0xff] }
   0xf   :  { %943 = vmatpush.msra.mxu2 %v135_v17  ;;  %v113_v45 = vld [vmem:[%s1623_s2 + $0x28] sm:$0xff]  ;;  %v112_v46 = vld [vmem:[%s1623_s2 + $0x20] sm:$0xff]  ;;  %v111_v48 = vld [vmem:[%s1623_s2 + $0x18] sm:$0xff] }
  0x10   :  { %82 = vmatpush.msra.mxu0 %v1108_v7  ;;  %145 = vmatpush.msra.mxu1 %v134_v18  ;;  %v110_v49 = vld [vmem:[%s1623_s2 + $0x10] sm:$0xff]  ;;  %v109_v50 = vld [vmem:[%s1623_s2 + $0x8] sm:$0xff]  ;;  %v108_v51 = vld [vmem:[%s1623_s2] sm:$0xff]  ;;  %s1022_s2 = smov 32  }
  0x11   :  { %907 = vmatmul.msk.f32.vlgmr.msra.gmra.mxu0 %vm42_vm0, %v26_v8  ;;  %944 = vmatpush.msra.mxu2 %v134_v18  ;;  %v288_v56 = vld [vmem:[%s1625_s5 + $0xf0] sm:$0xff]  ;;  %v286_v57 = vld [vmem:[%s1625_s5 + $0xe0] sm:$0xff] }
  0x12   :  { %146 = vmatpush.msra.mxu1 %v133_v19  ;;  %735 = vrot.lane.b32.xlu0 %v1108_v7, %s1022_s2  ;;  %v284_v58 = vld [vmem:[%s1625_s5 + $0xd0] sm:$0xff]  ;;  %v282_v59 = vld [vmem:[%s1625_s5 + $0xc0] sm:$0xff] }
  0x13   :  { %945 = vmatpush.msra.mxu2 %v133_v19  ;;  %739 = vrot.lane.b32.xlu1 %v1096_v5, %s1022_s2  ;;  %v280_v60 = vld [vmem:[%s1625_s5 + $0xb0] sm:$0xff]  ;;  %v278_v61 = vld [vmem:[%s1625_s5 + $0xa0] sm:$0xff] }
  0x14   :  { %147 = vmatpush.msra.mxu1 %v132_v20  ;;  %743 = vrot.lane.b32.xlu2 %v1084_v3, %s1022_s2  ;;  %v276_v62 = vld [vmem:[%s1625_s5 + $0x90] sm:$0xff]  ;;  %v274_v63 = vld [vmem:[%s1625_s5 + $0x80] sm:$0xff] }
  0x15   :  { %946 = vmatpush.msra.mxu2 %v132_v20  ;;  %405 = vmatpush.msrb.mxu0 %v288_v56  ;;  %v272_v8 = vld [vmem:[%s1625_s5 + $0x70] sm:$0xff]  ;;  %v294_v12 = vld [vmem:[%s1626_s6 + $0x20] sm:$0xff] }
  0x16   :  { %148 = vmatpush.msra.mxu1 %v131_v22  ;;  %v268_v13 = vld [vmem:[%s1625_s5 + $0x50] sm:$0xff]  ;;  %v266_v15 = vld [vmem:[%s1625_s5 + $0x40] sm:$0xff] }
  0x17   :  { %947 = vmatpush.msra.mxu2 %v131_v22  ;;  %406 = vmatpush.msrb.mxu0 %v286_v57  ;;  %v292_v14 = vld [vmem:[%s1626_s6 + $0x10] sm:$0xff]  ;;  %v262_v19 = vld [vmem:[%s1625_s5 + $0x20] sm:$0xff]  ;;  %v291_v57 = vld [vmem:[%s1626_s6 + $0x8] sm:$0xff] }
  0x18   :  { %149 = vmatpush.msra.mxu1 %v130_v23  ;;  %v264_v17 = vld [vmem:[%s1625_s5 + $0x30] sm:$0xff]  ;;  %v258_v22 = vld [vmem:[%s1625_s5] sm:$0xff] }
  0x19   :  { %908 = vmatmul.msk.f32.gmra.mxu0 %vm42_vm0, %v27_v9  ;;  %948 = vmatpush.msra.mxu2 %v130_v23  ;;  %v260_v20 = vld [vmem:[%s1625_s5 + $0x10] sm:$0xff] }
  0x1a   :  { %150 = vmatpush.msra.mxu1 %v129_v24  ;;  %737 = vrot.lane.b32.xlu0 %v1102_v6, %s1022_s2 }
  0x1b   :  { %949 = vmatpush.msra.mxu2 %v129_v24  ;;  %741 = vrot.lane.b32.xlu1 %v1090_v4, %s1022_s2 }
  0x1c   :  { %151 = vmatpush.msra.mxu1 %v128_v25  ;;  %745 = vrot.lane.b32.xlu2 %v1078_v2, %s1022_s2 }
  0x1d   :  { %950 = vmatpush.msra.mxu2 %v128_v25  ;;  %407 = vmatpush.msrb.mxu0 %v284_v58  ;;  %v275_v58 = vld [vmem:[%s1625_s5 + $0x88] sm:$0xff] }
  0x1e   :  { %152 = vmatpush.msra.mxu1 %v127_v27 }
  0x1f   :  { %951 = vmatpush.msra.mxu2 %v127_v27  ;;  %408 = vmatpush.msrb.mxu0 %v282_v59  ;;  %v1360_v27 = vld [vmem:[%s1624_s4] ss:$0 sm:$0xff]  ;;  %v273_v59 = vld [vmem:[%s1625_s5 + $0x78] sm:$0xff] }
  0x20   :  { %153 = vmatpush.msra.mxu1 %v126_v28 }
  0x21   :  { %909 = vmatmul.msk.f32.gmra.mxu0 %vm42_vm0, %v28_v10  ;;  %952 = vmatpush.msra.mxu2 %v126_v28  ;;  %v296_v10 = vld [vmem:[%s1626_s6 + $0x30] sm:$0xff] }
  0x22   :  { %154 = vmatpush.msra.mxu1 %v125_v29  ;;  %747 = vrot.lane.b32.xlu0 %v1072_v1, %s1022_s2 }
  0x23   :  { %953 = vmatpush.msra.mxu2 %v125_v29  ;;  %749 = vrot.lane.b32.xlu1 %v1067_v0, %s1022_s2 }
  0x24   :  { %155 = vmatpush.msra.mxu1 %v124_v31  ;;  %655 = vrot.lane.b32.xlu2 %v1108_v7, %s1023_s1 }
  0x25   :  { %954 = vmatpush.msra.mxu2 %v124_v31  ;;  %409 = vmatpush.msrb.mxu0 %v280_v60 }
  0x26   :  { %335 = vmatpush.msra.mxu3 %v296_v10 }
  0x27   :  { %181 = vmatpush.msrb.mxu2 %v123_v33  ;;  %410 = vmatpush.msrb.mxu0 %v278_v61 }
  0x28   :  { %336 = vmatpush.msra.mxu3 %v294_v12 }
  0x29   :  { %910 = vmatmul.msk.f32.gmra.mxu0 %vm42_vm0, %v29_v11  ;;  %182 = vmatpush.msrb.mxu2 %v122_v34  ;;  %v270_v11 = vld [vmem:[%s1625_s5 + $0x60] sm:$0xff] }
  0x2a   :  { %657 = vrot.lane.b32.xlu0 %v1102_v6, %s1023_s1  ;;  %411 = vmatpush.msrb.mxu0 %v276_v62 }
  0x2b   :  { %183 = vmatpush.msrb.mxu2 %v121_v35  ;;  %659 = vrot.lane.b32.xlu1 %v1096_v5, %s1023_s1 }
  0x2c   :  { %661 = vrot.lane.b32.xlu2 %v1090_v4, %s1023_s1  ;;  %412 = vmatpush.msrb.mxu0 %v274_v63  ;;  %v271_v63 = vld [vmem:[%s1625_s5 + $0x68] sm:$0xff] }
  0x2d   :  { %184 = vmatpush.msrb.mxu2 %v120_v36  ;;  %337 = vmatpush.msra.mxu3 %v292_v14 }
  0x2e   :  { %413 = vmatpush.msrb.mxu0 %v272_v8  ;;  %v269_v8 = vld [vmem:[%s1625_s5 + $0x58] sm:$0xff] }
  0x2f   :  { %185 = vmatpush.msrb.mxu2 %v119_v38  ;;  %v289_v38 = vld [vmem:[%s1625_s5 + $0xf8] sm:$0xff] }
  0x30   :  { %414 = vmatpush.msrb.mxu0 %v270_v11  ;;  %446 = vmatpush.msrb.mxu1 %v289_v38  ;;  %v267_v11 = vld [vmem:[%s1625_s5 + $0x48] sm:$0xff] }
  0x31   :  { %911 = vmatmul.msk.f32.gmra.mxu0 %vm42_vm0, %v30_v16  ;;  %186 = vmatpush.msrb.mxu2 %v118_v39  ;;  %v290_v16 = vld [vmem:[%s1626_s6] sm:$0xff] }
  0x32   :  { %663 = vrot.lane.b32.xlu0 %v1084_v3, %s1023_s1  ;;  %415 = vmatpush.msrb.mxu0 %v268_v13  ;;  %v265_v13 = vld [vmem:[%s1625_s5 + $0x38] sm:$0xff] }
  0x33   :  { %187 = vmatpush.msrb.mxu2 %v117_v40  ;;  %665 = vrot.lane.b32.xlu1 %v1078_v2, %s1023_s1 }
  0x34   :  { %667 = vrot.lane.b32.xlu2 %v1072_v1, %s1023_s1  ;;  %416 = vmatpush.msrb.mxu0 %v266_v15 }
  0x35   :  { %188 = vmatpush.msrb.mxu2 %v116_v41  ;;  %338 = vmatpush.msra.mxu3 %v290_v16  ;;  %v263_v16 = vld [vmem:[%s1625_s5 + $0x28] sm:$0xff] }
  0x36   :  { %417 = vmatpush.msrb.mxu0 %v264_v17  ;;  %v261_v17 = vld [vmem:[%s1625_s5 + $0x18] sm:$0xff] }
  0x37   :  { %189 = vmatpush.msrb.mxu2 %v115_v43  ;;  %v287_v43 = vld [vmem:[%s1625_s5 + $0xe8] sm:$0xff] }
  0x38   :  { %418 = vmatpush.msrb.mxu0 %v262_v19  ;;  %447 = vmatpush.msrb.mxu1 %v287_v43 }
  0x39   :  { %912 = vmatmul.msk.f32.gmra.mxu0 %vm42_vm0, %v31_v21  ;;  %190 = vmatpush.msrb.mxu2 %v114_v44  ;;  %v297_v21 = vld [vmem:[%s1626_s6 + $0x38] sm:$0xff] }
  0x3a   :  { %669 = vrot.lane.b32.xlu0 %v1067_v0, %s1023_s1  ;;  %419 = vmatpush.msrb.mxu0 %v260_v20  ;;  %v259_v20 = vld [vmem:[%s1625_s5 + $0x8] sm:$0xff] }
  0x3b   :  { %191 = vmatpush.msrb.mxu2 %v113_v45  ;;  %376 = vmatpush.msrb.mxu3 %v297_v21  ;;  %v285_v45 = vld [vmem:[%s1625_s5 + $0xd8] sm:$0xff] }
  0x3c   :  { %420 = vmatpush.msrb.mxu0 %v258_v22  ;;  %448 = vmatpush.msrb.mxu1 %v285_v45 }
  0x3d   :  { %192 = vmatpush.msrb.mxu2 %v112_v46 }
  0x3f   :  { %193 = vmatpush.msrb.mxu2 %v111_v48  ;;  %v281_v48 = vld [vmem:[%s1625_s5 + $0xb8] sm:$0xff] }
  0x41   :  { %913 = vmatmul.msk.f32.gmra.mxu0 %vm42_vm0, %v32_v26  ;;  %194 = vmatpush.msrb.mxu2 %v110_v49  ;;  %v295_v26 = vld [vmem:[%s1626_s6 + $0x28] sm:$0xff] }
  0x42   :  { %377 = vmatpush.msrb.mxu3 %v295_v26 }
  0x43   :  { %195 = vmatpush.msrb.mxu2 %v109_v50 }
  0x45   :  { %196 = vmatpush.msrb.mxu2 %v108_v51 }
  0x49   :  { %914 = vmatmul.msk.f32.gmra.mxu0 %vm42_vm0, %v33_v30 }
  0x51   :  { %421 = vmatmul.f32.vlgmr.msrb.gmra.mxu0 %v1108_v7 }
  0x59   :  { %424 = vmatmul.f32.gmra.mxu0 %v1102_v6 }
  0x61   :  { %427 = vmatmul.f32.gmra.mxu0 %v1096_v5 }
  0x69   :  { %430 = vmatmul.f32.gmra.mxu0 %v1090_v4 }
  0x71   :  { %433 = vmatmul.f32.gmra.mxu0 %v1084_v3 }
  0x79   :  { %436 = vmatmul.f32.gmra.mxu0 %v1078_v2 }
  0x81   :  { %439 = vmatmul.f32.gmra.mxu0 %v1072_v1 }
  0x89   :  { %442 = vmatmul.f32.gmra.mxu0 %v1067_v0 }
  0x8e   :  { %v84_v32 = vpop.f32.mrf.mxu0 }
  0x8f   :  { %156 = vmatmul.f32.vlgmr.msra.gmra.mxu1 %v84_v32 }
  0x96   :  { %v87_v37 = vpop.f32.mrf.mxu0 }
  0x97   :  { %159 = vmatmul.f32.gmra.mxu1 %v87_v37  ;;  %v293_v37 = vld [vmem:[%s1626_s6 + $0x18] sm:$0xff] }
  0x98   :  { %378 = vmatpush.msrb.mxu3 %v293_v37 }
  0x9a   :  { %379 = vmatpush.msrb.mxu3 %v291_v57 }
  0x9e   :  { %v90_v42 = vpop.f32.mrf.mxu0 }
  0x9f   :  { %162 = vmatmul.f32.gmra.mxu1 %v90_v42 }
  0xa6   :  { %v93_v47 = vpop.f32.mrf.mxu0 }
  0xa7   :  { %165 = vmatmul.f32.gmra.mxu1 %v93_v47  ;;  %v283_v47 = vld [vmem:[%s1625_s5 + $0xc8] sm:$0xff] }
  0xa8   :  { %449 = vmatpush.msrb.mxu1 %v283_v47 }
  0xaa   :  { %450 = vmatpush.msrb.mxu1 %v281_v48 }
  0xae   :  { %v96_v52 = vpop.f32.mrf.mxu0 }
  0xaf   :  { %168 = vmatmul.f32.vlgmr.msra.gmra.mxu2 %v96_v52 }
  0xb6   :  { %v99_v53 = vpop.f32.mrf.mxu0 }
  0xb7   :  { %171 = vmatmul.f32.gmra.mxu2 %v99_v53  ;;  %v279_v53 = vld [vmem:[%s1625_s5 + $0xa8] sm:$0xff] }
  0xb8   :  { %451 = vmatpush.msrb.mxu1 %v279_v53 }
  0xbe   :  { %v102_v54 = vpop.f32.mrf.mxu0 }
  0xbf   :  { %174 = vmatmul.f32.gmra.mxu2 %v102_v54 }
  0xc6   :  { %v105_v55 = vpop.f32.mrf.mxu0 }
  0xc7   :  { %177 = vmatmul.f32.gmra.mxu2 %v105_v55  ;;  %v277_v55 = vld [vmem:[%s1625_s5 + $0x98] sm:$0xff] }
  0xc8   :  { %452 = vmatpush.msrb.mxu1 %v277_v55 }
  0xca   :  { %453 = vmatpush.msrb.mxu1 %v275_v58 }
  0xcc   :  { %454 = vmatpush.msrb.mxu1 %v273_v59 }
  0xce   :  { %455 = vmatpush.msrb.mxu1 %v271_v63 }
  0xcf   :  { %197 = vmatmul.f32.vlgmr.msrb.gmra.mxu2 %v1108_v7 }
  0xd0   :  { %456 = vmatpush.msrb.mxu1 %v269_v8 }
  0xd2   :  { %457 = vmatpush.msrb.mxu1 %v267_v11 }
  0xd4   :  { %458 = vmatpush.msrb.mxu1 %v265_v13 }
  0xd6   :  { %459 = vmatpush.msrb.mxu1 %v263_v16 }
  0xd7   :  { %200 = vmatmul.f32.gmra.mxu2 %v1102_v6 }
  0xd8   :  { %460 = vmatpush.msrb.mxu1 %v261_v17 }
  0xda   :  { %461 = vmatpush.msrb.mxu1 %v259_v20 }
  0xdb   :  { %462 = vmatmul.f32.vlgmr.msrb.gmra.mxu1 %v1108_v7 }
  0xdf   :  { %203 = vmatmul.f32.gmra.mxu2 %v1096_v5 }
  0xe3   :  { %465 = vmatmul.f32.gmra.mxu1 %v1102_v6 }
  0xe7   :  { %206 = vmatmul.f32.gmra.mxu2 %v1090_v4 }
  0xeb   :  { %468 = vmatmul.f32.gmra.mxu1 %v1096_v5 }
  0xef   :  { %209 = vmatmul.f32.gmra.mxu2 %v1084_v3 }
  0xf3   :  { %471 = vmatmul.f32.gmra.mxu1 %v1090_v4 }
  0xf7   :  { %212 = vmatmul.f32.gmra.mxu2 %v1078_v2 }
  0xfb   :  { %474 = vmatmul.f32.gmra.mxu1 %v1084_v3  ;;  %v422_v3 = vpop.f32.mrf.mxu0 }
  0xff   :  { %215 = vmatmul.f32.gmra.mxu2 %v1072_v1 }
 0x103   :  { %477 = vmatmul.f32.gmra.mxu1 %v1078_v2  ;;  %v425_v2 = vpop.f32.mrf.mxu0 }
 0x107   :  { %218 = vmatmul.f32.gmra.mxu2 %v1067_v0 }
 0x10b   :  { %480 = vmatmul.f32.gmra.mxu1 %v1072_v1 }
 0x10c   :  { %v157_v25 = vpop.f32.mrf.mxu1 }
 0x113   :  { %483 = vmatmul.f32.gmra.mxu1 %v1067_v0 }
 0x114   :  { %v160_v31 = vpop.f32.mrf.mxu1 }
 0x11c   :  { %v163_v40 = vpop.f32.mrf.mxu1 }
 0x124   :  { %v166_v51 = vpop.f32.mrf.mxu1 }
 0x132   :  { %v1307_v9 = vpop.f32.mrf.mxu2 }
 0x13a   :  { %v1333_v18 = vpop.f32.mrf.mxu2 }
 0x142   :  { %v1348_v23 = vpop.f32.mrf.mxu2 }
 0x14a   :  { %v1351_v24 = vpop.f32.mrf.mxu2 }
 0x152   :  { %v198_v28 = vpop.f32.mrf.mxu2 }
 0x153   :  { %v199_v29 = vadd.f32 %v198_v28, %v157_v25 }
 0x155   :  { %v226_v30 = vadd.f32 %v1360_v27, %v199_v29 }
 0x157   :  { %vm234_vm1 = vcmp.gt.f32.partialorder %v226_v30, 0.0  ;;  %v242_v32 = vmul.f32 0.01, %v226_v30 }
 0x159   :  { %v1364_v33 = vsel %vm234_vm1, %v226_v30, %v242_v32 }
 0x15a   :  { %v201_v34 = vpop.f32.mrf.mxu2  ;;  %915 = vmatmul.msk.f32.vlgmr.msra.gmra.mxu3 %vm298_vm2, %v1364_v33 }
 0x15b   :  { %v202_v35 = vadd.f32 %v201_v34, %v160_v31 }
 0x15d   :  { %v227_v36 = vadd.f32 %v1360_v27, %v202_v35 }
 0x15f   :  { %vm235_vm3 = vcmp.gt.f32.partialorder %v227_v36, 0.0  ;;  %v243_v39 = vmul.f32 0.01, %v227_v36 }
 0x161   :  { %v1376_v41 = vsel %vm235_vm3, %v227_v36, %v243_v39 }
 0x162   :  { %v204_v42 = vpop.f32.mrf.mxu2  ;;  %916 = vmatmul.msk.f32.gmra.mxu3 %vm298_vm2, %v1376_v41 }
 0x163   :  { %v205_v44 = vadd.f32 %v204_v42, %v163_v40 }
 0x165   :  { %v228_v46 = vadd.f32 %v1360_v27, %v205_v44 }
 0x167   :  { %vm236_vm4 = vcmp.gt.f32.partialorder %v228_v46, 0.0  ;;  %v244_v49 = vmul.f32 0.01, %v228_v46 }
 0x169   :  { %v1394_v50 = vsel %vm236_vm4, %v228_v46, %v244_v49 }
 0x16a   :  { %v207_v52 = vpop.f32.mrf.mxu2  ;;  %917 = vmatmul.msk.f32.gmra.mxu3 %vm298_vm2, %v1394_v50 }
 0x16b   :  { %v208_v54 = vadd.f32 %v207_v52, %v166_v51 }
 0x16d   :  { %v229_v56 = vadd.f32 %v1360_v27, %v208_v54  ;;  %v736_v54 = vpop.permute.xlu0 %735 }
 0x16f   :  { %vm237_vm5 = vcmp.gt.f32.partialorder %v229_v56, 0.0  ;;  %v245_v60 = vmul.f32 0.01, %v229_v56 }
 0x171   :  { %v253_v61 = vsel %vm237_vm5, %v229_v56, %v245_v60 }
 0x172   :  { %v210_v62 = vpop.f32.mrf.mxu2  ;;  %918 = vmatmul.msk.f32.gmra.mxu3 %vm298_vm2, %v253_v61 }
 0x173   :  { %v211_v10 = vadd.f32 %v210_v62, %v1307_v9 }
 0x175   :  { %v230_v12 = vadd.f32 %v1360_v27, %v211_v10 }
 0x177   :  { %vm238_vm6 = vcmp.gt.f32.partialorder %v230_v12, 0.0  ;;  %v246_v14 = vmul.f32 0.01, %v230_v12 }
 0x179   :  { %v254_v15 = vsel %vm238_vm6, %v230_v12, %v246_v14 }
 0x17a   :  { %v213_v9 = vpop.f32.mrf.mxu2  ;;  %919 = vmatmul.msk.f32.gmra.mxu3 %vm298_vm2, %v254_v15 }
 0x17b   :  { %v214_v19 = vadd.f32 %v213_v9, %v1333_v18 }
 0x17d   :  { %v231_v21 = vadd.f32 %v1360_v27, %v214_v19 }
 0x17f   :  { %vm239_vm7 = vcmp.gt.f32.partialorder %v231_v21, 0.0  ;;  %v247_v22 = vmul.f32 0.01, %v231_v21 }
 0x181   :  { %v255_v25 = vsel %vm239_vm7, %v231_v21, %v247_v22  ;;  %v738_v21 = vpop.permute.xlu0 %737 }
 0x182   :  { %v216_v26 = vpop.f32.mrf.mxu2  ;;  %920 = vmatmul.msk.f32.gmra.mxu3 %vm298_vm2, %v255_v25 }
 0x183   :  { %v217_v28 = vadd.f32 %v216_v26, %v1348_v23 }
 0x185   :  { %v232_v18 = vadd.f32 %v1360_v27, %v217_v28 }
 0x187   :  { %vm240_vm8 = vcmp.gt.f32.partialorder %v232_v18, 0.0  ;;  %v248_v29 = vmul.f32 0.01, %v232_v18 }
 0x189   :  { %v256_v30 = vsel %vm240_vm8, %v232_v18, %v248_v29 }
 0x18a   :  { %v219_v31 = vpop.f32.mrf.mxu2  ;;  %921 = vmatmul.msk.f32.gmra.mxu3 %vm298_vm2, %v256_v30 }
 0x18b   :  { %v220_v32 = vadd.f32 %v219_v31, %v1351_v24  ;;  %v428_v24 = vpop.f32.mrf.mxu0 }
 0x18d   :  { %v233_v7 = vadd.f32 %v1360_v27, %v220_v32 }
 0x18f   :  { %vm241_vm9 = vcmp.gt.f32.partialorder %v233_v7, 0.0  ;;  %v249_v34 = vmul.f32 0.01, %v233_v7 }
 0x191   :  { %v257_v35 = vsel %vm241_vm9, %v233_v7, %v249_v34  ;;  %v740_v34 = vpop.permute.xlu1 %739 }
 0x192   :  { %922 = vmatmul.msk.f32.gmra.mxu3 %vm298_vm2, %v257_v35 }
 0x193   :  { %v431_v42 = vpop.f32.mrf.mxu0 }
 0x19a   :  { %923 = vmatmul.msk.f32.vlgmr.msrb.gmra.mxu3 %vm298_vm2, %v1364_v33 }
 0x19b   :  { %v434_v60 = vpop.f32.mrf.mxu0 }
 0x1a2   :  { %924 = vmatmul.msk.f32.gmra.mxu3 %vm298_vm2, %v1376_v41 }
 0x1aa   :  { %925 = vmatmul.msk.f32.gmra.mxu3 %vm298_vm2, %v1394_v50 }
 0x1b2   :  { %926 = vmatmul.msk.f32.gmra.mxu3 %vm298_vm2, %v253_v61 }
 0x1ba   :  { %927 = vmatmul.msk.f32.gmra.mxu3 %vm298_vm2, %v254_v15 }
 0x1c2   :  { %928 = vmatmul.msk.f32.gmra.mxu3 %vm298_vm2, %v255_v25 }
 0x1ca   :  { %929 = vmatmul.msk.f32.gmra.mxu3 %vm298_vm2, %v256_v30 }
 0x1d2   :  { %930 = vmatmul.msk.f32.gmra.mxu3 %vm298_vm2, %v257_v35 }
 0x1dd   :  { %v340_v4 = vpop.f32.mrf.mxu3 }
 0x1de   :  { %v423_v5 = vadd.f32 %v422_v3, %v340_v4 }
 0x1e0   :  { %v931_v6 = vmul.f32 -1.442695, %v423_v5 }
 0x1e2   :  { %958 = vpow2.f32 %v931_v6 }
 0x1e5   :  { %v343_v23 = vpop.f32.mrf.mxu3 }
 0x1e6   :  { %v426_v1 = vadd.f32 %v425_v2, %v343_v23 }
 0x1e8   :  { %v959_v27 = vpop.eup %958  ;;  %v932_v33 = vmul.f32 -1.442695, %v426_v1 }
 0x1e9   :  { %v511_v0 = vadd.f32 1.0, %v959_v27  ;;  %v463_v27 = vpop.f32.mrf.mxu1 }
 0x1ea   :  { %960 = vpow2.f32 %v932_v33 }
 0x1eb   :  { %962 = vrcp.f32 %v511_v0  ;;  %v530_v45 = vand.u32 2147483648, %v511_v0  ;;  %v528_v48 = vand.u32 2147483647, %v511_v0  ;;  %vm524_vm11 = vweird.f32 %v511_v0 }
 0x1ed   :  { %v346_v36 = vpop.f32.mrf.mxu3  ;;  %v531_v55 = vor.u32 1.1754944e-38, %v530_v45  ;;  %vm529_vm13 = vcmp.eq.f32.partialorder %v528_v48, 8.507059e+37 }
 0x1ee   :  { %v429_v37 = vadd.f32 %v428_v24, %v346_v36 }
 0x1f0   :  { %v961_v38 = vpop.eup %960  ;;  %v933_v39 = vmul.f32 -1.442695, %v429_v37 }
 0x1f1   :  { %v963_v40 = vpop.eup %962  ;;  %v512_v41 = vadd.f32 1.0, %v961_v38 }
 0x1f2   :  { %v520_v43 = vmul.f32 %v963_v40, %v511_v0  ;;  %964 = vpow2.f32 %v933_v39  ;;  %vm525_vm10 = vweird.f32 %v963_v40 }
 0x1f3   :  { %966 = vrcp.f32 %v512_v41  ;;  %vm526_vm12 = vmor %vm524_vm11, %vm525_vm10  ;;  %v545_v63 = vand.u32 2147483648, %v512_v41  ;;  %v543_v11 = vand.u32 2147483647, %v512_v41  ;;  %vm539_vm15 = vweird.f32 %v512_v41 }
 0x1f4   :  { %v521_v44 = vsub.f32 1.0, %v520_v43  ;;  %v437_v43 = vpop.f32.mrf.mxu0 }
 0x1f5   :  { %v349_v46 = vpop.f32.mrf.mxu3  ;;  %v546_v16 = vor.u32 1.1754944e-38, %v545_v63  ;;  %vm544_vm3 = vcmp.eq.f32.partialorder %v543_v11, 8.507059e+37 }
 0x1f6   :  { %v522_v47 = vmul.f32 %v963_v40, %v521_v44  ;;  %v432_v49 = vadd.f32 %v431_v42, %v349_v46 }
 0x1f8   :  { %v965_v50 = vpop.eup %964  ;;  %v523_v51 = vadd.f32 %v963_v40, %v522_v47  ;;  %v934_v52 = vmul.f32 -1.442695, %v432_v49 }
 0x1f9   :  { %v967_v53 = vpop.eup %966  ;;  %v513_v56 = vadd.f32 1.0, %v965_v50  ;;  %v466_v50 = vpop.f32.mrf.mxu1 }
 0x1fa   :  { %v527_v57 = vsel %vm526_vm12, %v963_v40, %v523_v51  ;;  %v535_v58 = vmul.f32 %v967_v53, %v512_v41  ;;  %968 = vpow2.f32 %v934_v52  ;;  %vm540_vm14 = vweird.f32 %v967_v53  ;;  %v742_v41 = vpop.permute.xlu1 %741 }
 0x1fb   :  { %v1469_v59 = vsel %vm529_vm13, %v531_v55, %v527_v57  ;;  %970 = vrcp.f32 %v513_v56  ;;  %vm541_vm1 = vmor %vm539_vm15, %vm540_vm14  ;;  %v560_v28 = vand.u32 2147483648, %v513_v56  ;;  %v558_v30 = vand.u32 2147483647, %v513_v56 }
 0x1fc   :  { %v759_v61 = vmul.f32 %v736_v54, %v1469_v59  ;;  %v536_v62 = vsub.f32 1.0, %v535_v58  ;;  %vm554_vm5 = vweird.f32 %v513_v56  ;;  %v744_v54 = vpop.permute.xlu2 %743  ;;  %v440_v58 = vpop.f32.mrf.mxu0 }
 0x1fd   :  { %v352_v8 = vpop.f32.mrf.mxu3  ;;  %v561_v35 = vor.u32 1.1754944e-38, %v560_v28  ;;  %vm559_vm7 = vcmp.eq.f32.partialorder %v558_v30, 8.507059e+37 }
 0x1fe   :  { %v537_v10 = vmul.f32 %v967_v53, %v536_v62  ;;  %v435_v12 = vadd.f32 %v434_v60, %v352_v8  ;;  %775 = vrot.lane.b32.xlu0 %v759_v61, %s1023_s1 }
 0x200   :  { %v969_v13 = vpop.eup %968  ;;  %v538_v14 = vadd.f32 %v967_v53, %v537_v10  ;;  %v935_v15 = vmul.f32 -1.442695, %v435_v12 }
 0x201   :  { %v971_v9 = vpop.eup %970  ;;  %v514_v17 = vadd.f32 1.0, %v969_v13  ;;  %v469_v63 = vpop.f32.mrf.mxu1 }
 0x202   :  { %v550_v19 = vmul.f32 %v971_v9, %v513_v56  ;;  %v542_v20 = vsel %vm541_vm1, %v967_v53, %v538_v14  ;;  %972 = vpow2.f32 %v935_v15  ;;  %vm555_vm4 = vweird.f32 %v971_v9 }
 0x203   :  { %v1473_v22 = vsel %vm544_vm3, %v546_v16, %v542_v20  ;;  %974 = vrcp.f32 %v514_v17  ;;  %vm556_vm6 = vmor %vm554_vm5, %vm555_vm4  ;;  %v575_v1 = vand.u32 2147483648, %v514_v17  ;;  %v573_v0 = vand.u32 2147483647, %v514_v17 }
 0x204   :  { %v551_v25 = vsub.f32 1.0, %v550_v19  ;;  %v760_v26 = vmul.f32 %v738_v21, %v1473_v22  ;;  %vm569_vm9 = vweird.f32 %v514_v17  ;;  %v443_v14 = vpop.f32.mrf.mxu0 }
 0x205   :  { %v355_v18 = vpop.f32.mrf.mxu3  ;;  %v576_v38 = vor.u32 1.1754944e-38, %v575_v1  ;;  %vm574_vm11 = vcmp.eq.f32.partialorder %v573_v0, 8.507059e+37 }
 0x206   :  { %v552_v29 = vmul.f32 %v971_v9, %v551_v25  ;;  %777 = vrot.lane.b32.xlu1 %v760_v26, %s1023_s1  ;;  %v438_v56 = vadd.f32 %v437_v43, %v355_v18 }
 0x208   :  { %v973_v31 = vpop.eup %972  ;;  %v553_v32 = vadd.f32 %v971_v9, %v552_v29  ;;  %v936_v62 = vmul.f32 -1.442695, %v438_v56 }
 0x209   :  { %v975_v7 = vpop.eup %974  ;;  %v515_v3 = vadd.f32 1.0, %v973_v31 }
 0x20a   :  { %v557_v4 = vsel %vm556_vm6, %v971_v9, %v553_v32  ;;  %v565_v2 = vmul.f32 %v975_v7, %v514_v17  ;;  %vm570_vm8 = vweird.f32 %v975_v7  ;;  %v472_v17 = vpop.f32.mrf.mxu1 }
 0x20b   :  { %v1477_v5 = vsel %vm559_vm7, %v561_v35, %v557_v4  ;;  %976 = vrcp.f32 %v515_v3  ;;  %vm571_vm10 = vmor %vm569_vm9, %vm570_vm8  ;;  %v590_v47 = vand.u32 2147483648, %v515_v3  ;;  %v588_v49 = vand.u32 2147483647, %v515_v3 }
 0x20c   :  { %v761_v6 = vmul.f32 %v740_v34, %v1477_v5  ;;  %v566_v23 = vsub.f32 1.0, %v565_v2  ;;  %vm584_vm13 = vweird.f32 %v515_v3 }
 0x20d   :  { %v358_v24 = vpop.f32.mrf.mxu3  ;;  %v591_v52 = vor.u32 1.1754944e-38, %v590_v47  ;;  %vm589_vm15 = vcmp.eq.f32.partialorder %v588_v49, 8.507059e+37 }
 0x20e   :  { %v567_v33 = vmul.f32 %v975_v7, %v566_v23  ;;  %779 = vrot.lane.b32.xlu2 %v761_v6, %s1023_s1  ;;  %v441_v8 = vadd.f32 %v440_v58, %v358_v24 }
 0x210   :  { %v568_v36 = vadd.f32 %v975_v7, %v567_v33  ;;  %v937_v12 = vmul.f32 -1.442695, %v441_v8 }
 0x211   :  { %v977_v37 = vpop.eup %976 }
 0x212   :  { %v572_v39 = vsel %vm571_vm10, %v975_v7, %v568_v36  ;;  %v580_v40 = vmul.f32 %v977_v37, %v515_v3  ;;  %vm585_vm12 = vweird.f32 %v977_v37  ;;  %v475_v31 = vpop.f32.mrf.mxu1 }
 0x213   :  { %v1481_v42 = vsel %vm574_vm11, %v576_v38, %v572_v39  ;;  %vm586_vm14 = vmor %vm584_vm13, %vm585_vm12 }
 0x214   :  { %v762_v44 = vmul.f32 %v742_v41, %v1481_v42  ;;  %v581_v45 = vsub.f32 1.0, %v580_v40 }
 0x215   :  { %v361_v46 = vpop.f32.mrf.mxu3 }
 0x216   :  { %781 = vrot.lane.b32.xlu0 %v762_v44, %s1023_s1  ;;  %v582_v48 = vmul.f32 %v977_v37, %v581_v45  ;;  %v444_v16 = vadd.f32 %v443_v14, %v361_v46 }
 0x218   :  { %v583_v51 = vadd.f32 %v977_v37, %v582_v48  ;;  %v938_v25 = vmul.f32 -1.442695, %v444_v16  ;;  %v748_v16 = vpop.permute.xlu0 %747 }
 0x21a   :  { %v587_v53 = vsel %vm586_vm14, %v977_v37, %v583_v51  ;;  %v478_v0 = vpop.f32.mrf.mxu1 }
 0x21b   :  { %v1485_v55 = vsel %vm589_vm15, %v591_v52, %v587_v53 }
 0x21c   :  { %v763_v57 = vmul.f32 %v744_v54, %v1485_v55 }
 0x21d   :  { %v381_v60 = vpop.f32.mrf.mxu3 }
 0x21e   :  { %v464_v61 = vadd.f32 %v463_v27, %v381_v60  ;;  %783 = vrot.lane.b32.xlu1 %v763_v57, %s1023_s1 }
 0x220   :  { %978 = vtanh.f32 %v464_v61 }
 0x221   :  { %980 = vpow2.f32 %v936_v62 }
 0x225   :  { %v384_v10 = vpop.f32.mrf.mxu3 }
 0x226   :  { %v979_v11 = vpop.eup %978  ;;  %v467_v13 = vadd.f32 %v466_v50, %v384_v10  ;;  %v481_v50 = vpop.f32.mrf.mxu1 }
 0x227   :  { %v687_v15 = vmul.f32 %v979_v11, %v1469_v59  ;;  %v981_v9 = vpop.eup %980 }
 0x228   :  { %982 = vtanh.f32 %v467_v13  ;;  %v516_v19 = vadd.f32 1.0, %v981_v9 }
 0x229   :  { %703 = vrot.lane.b32.xlu1 %v687_v15, %s1022_s2  ;;  %984 = vpow2.f32 %v937_v12 }
 0x22a   :  { %v605_v46 = vand.u32 2147483648, %v516_v19  ;;  %vm599_vm3 = vweird.f32 %v516_v19  ;;  %v603_v47 = vand.u32 2147483647, %v516_v19 }
 0x22c   :  { %v606_v52 = vor.u32 1.1754944e-38, %v605_v46  ;;  %vm604_vm5 = vcmp.eq.f32.partialorder %v603_v47, 8.507059e+37 }
 0x22d   :  { %v387_v20 = vpop.f32.mrf.mxu3 }
 0x22e   :  { %v983_v21 = vpop.eup %982  ;;  %v470_v26 = vadd.f32 %v469_v63, %v387_v20  ;;  %v484_v12 = vpop.f32.mrf.mxu1 }
 0x22f   :  { %v688_v28 = vmul.f32 %v983_v21, %v1473_v22  ;;  %v985_v18 = vpop.eup %984 }
 0x230   :  { %986 = vtanh.f32 %v470_v26  ;;  %v517_v29 = vadd.f32 1.0, %v985_v18 }
 0x231   :  { %988 = vrcp.f32 %v516_v19  ;;  %705 = vrot.lane.b32.xlu2 %v688_v28, %s1022_s2 }
 0x232   :  { %990 = vpow2.f32 %v938_v25  ;;  %v620_v60 = vand.u32 2147483648, %v517_v29  ;;  %vm614_vm7 = vweird.f32 %v517_v29  ;;  %v618_v62 = vand.u32 2147483647, %v517_v29 }
 0x233   :  { %992 = vrcp.f32 %v517_v29 }
 0x234   :  { %v621_v11 = vor.u32 1.1754944e-38, %v620_v60  ;;  %vm619_vm9 = vcmp.eq.f32.partialorder %v618_v62, 8.507059e+37 }
 0x235   :  { %v390_v30 = vpop.f32.mrf.mxu3 }
 0x236   :  { %v987_v32 = vpop.eup %986  ;;  %v473_v7 = vadd.f32 %v472_v17, %v390_v30  ;;  %v750_v30 = vpop.permute.xlu1 %749 }
 0x237   :  { %v989_v34 = vpop.eup %988  ;;  %v689_v35 = vmul.f32 %v987_v32, %v1477_v5 }
 0x238   :  { %v991_v3 = vpop.eup %990  ;;  %994 = vtanh.f32 %v473_v7  ;;  %v595_v2 = vmul.f32 %v989_v34, %v516_v19  ;;  %vm600_vm1 = vweird.f32 %v989_v34  ;;  %v746_v7 = vpop.permute.xlu2 %745 }
 0x239   :  { %707 = vrot.lane.b32.xlu0 %v689_v35, %s1022_s2  ;;  %v1495_v4 = vadd.f32 1.0, %v991_v3  ;;  %v993_v6 = vpop.eup %992  ;;  %vm601_vm4 = vmor %vm599_vm3, %vm600_vm1 }
 0x23a   :  { %v596_v27 = vsub.f32 1.0, %v595_v2  ;;  %v610_v36 = vmul.f32 %v993_v6, %v517_v29  ;;  %vm615_vm6 = vweird.f32 %v993_v6 }
 0x23b   :  { %996 = vrcp.f32 %v1495_v4  ;;  %vm616_vm8 = vmor %vm614_vm7, %vm615_vm6  ;;  %v635_v17 = vand.u32 2147483648, %v1495_v4  ;;  %vm629_vm11 = vweird.f32 %v1495_v4  ;;  %v633_v20 = vand.u32 2147483647, %v1495_v4 }
 0x23c   :  { %v597_v37 = vmul.f32 %v989_v34, %v596_v27  ;;  %v611_v39 = vsub.f32 1.0, %v610_v36 }
 0x23d   :  { %v393_v23 = vpop.f32.mrf.mxu3  ;;  %v636_v28 = vor.u32 1.1754944e-38, %v635_v17  ;;  %vm634_vm13 = vcmp.eq.f32.partialorder %v633_v20, 8.507059e+37 }
 0x23e   :  { %v995_v1 = vpop.eup %994  ;;  %v476_v24 = vadd.f32 %v475_v31, %v393_v23  ;;  %v598_v44 = vadd.f32 %v989_v34, %v597_v37  ;;  %v612_v48 = vmul.f32 %v993_v6, %v611_v39 }
 0x23f   :  { %v690_v33 = vmul.f32 %v995_v1, %v1481_v42 }
 0x240   :  { %998 = vtanh.f32 %v476_v24  ;;  %v602_v51 = vsel %vm601_vm4, %v989_v34, %v598_v44  ;;  %v613_v53 = vadd.f32 %v993_v6, %v612_v48  ;;  %v656_v35 = vpop.permute.xlu2 %655 }
 0x241   :  { %709 = vrot.lane.b32.xlu1 %v690_v33, %s1022_s2  ;;  %v997_v38 = vpop.eup %996  ;;  %v1503_v58 = vsel %vm604_vm5, %v606_v52, %v602_v51 }
 0x242   :  { %v625_v49 = vmul.f32 %v997_v38, %v1495_v4  ;;  %v617_v8 = vsel %vm616_vm8, %v993_v6, %v613_v53  ;;  %vm630_vm10 = vweird.f32 %v997_v38  ;;  %v764_v34 = vmul.f32 %v746_v7, %v1503_v58  ;;  %v660_v4 = vpop.permute.xlu1 %659  ;;  %v658_v6 = vpop.permute.xlu0 %657 }
 0x243   :  { %v1507_v13 = vsel %vm619_vm9, %v621_v11, %v617_v8  ;;  %vm631_vm12 = vmor %vm629_vm11, %vm630_vm10  ;;  %v680_v24 = vmul.f32 %v658_v6, %v1473_v22  ;;  %v681_v53 = vmul.f32 %v660_v4, %v1477_v5 }
 0x244   :  { %v626_v54 = vsub.f32 1.0, %v625_v49  ;;  %v765_v21 = vmul.f32 %v748_v16, %v1507_v13 }
 0x245   :  { %v396_v40 = vpop.f32.mrf.mxu3 }
 0x246   :  { %v999_v41 = vpop.eup %998  ;;  %v479_v43 = vadd.f32 %v478_v0, %v396_v40  ;;  %v627_v10 = vmul.f32 %v997_v38, %v626_v54 }
 0x247   :  { %v691_v45 = vmul.f32 %v999_v41, %v1485_v55  ;;  %v679_v41 = vmul.f32 %v656_v35, %v1469_v59 }
 0x248   :  { %1000 = vtanh.f32 %v479_v43  ;;  %v628_v14 = vadd.f32 %v997_v38, %v627_v10  ;;  %v662_v3 = vpop.permute.xlu2 %661 }
 0x249   :  { %711 = vrot.lane.b32.xlu2 %v691_v45, %s1022_s2 }
 0x24a   :  { %v632_v26 = vsel %vm631_vm12, %v997_v38, %v628_v14  ;;  %v666_v23 = vpop.permute.xlu1 %665  ;;  %v664_v27 = vpop.permute.xlu0 %663 }
 0x24b   :  { %v1516_v18 = vsel %vm634_vm13, %v636_v28, %v632_v26  ;;  %v683_v47 = vmul.f32 %v664_v27, %v1485_v55  ;;  %v684_v14 = vmul.f32 %v666_v23, %v1503_v58 }
 0x24c   :  { %v766_v31 = vmul.f32 %v750_v30, %v1516_v18 }
 0x24d   :  { %v399_v56 = vpop.f32.mrf.mxu3 }
 0x24e   :  { %v1001_v57 = vpop.eup %1000  ;;  %v482_v61 = vadd.f32 %v481_v50, %v399_v56 }
 0x24f   :  { %v692_v63 = vmul.f32 %v1001_v57, %v1503_v58 }
 0x250   :  { %1002 = vtanh.f32 %v482_v61  ;;  %v668_v2 = vpop.permute.xlu2 %667  ;;  %v682_v61 = vmul.f32 %v662_v3, %v1481_v42 }
 0x251   :  { %713 = vrot.lane.b32.xlu0 %v692_v63, %s1022_s2 }
 0x252   :  { %v670_v38 = vpop.permute.xlu0 %669 }
 0x255   :  { %v402_v15 = vpop.f32.mrf.mxu3 }
 0x256   :  { %v1003_v9 = vpop.eup %1002  ;;  %v485_v19 = vadd.f32 %v484_v12, %v402_v15 }
 0x257   :  { %v693_v25 = vmul.f32 %v1003_v9, %v1507_v13 }
 0x258   :  { %1004 = vtanh.f32 %v485_v19  ;;  %v685_v19 = vmul.f32 %v668_v2, %v1507_v13 }
 0x259   :  { %787 = vrot.lane.b32.xlu0 %v765_v21, %s1023_s1  ;;  %715 = vrot.lane.b32.xlu1 %v693_v25, %s1022_s2 }
 0x25e   :  { %v1005_v29 = vpop.eup %1004 }
 0x25f   :  { %v694_v32 = vmul.f32 %v1005_v29, %v1516_v18  ;;  %v686_v29 = vmul.f32 %v670_v38, %v1516_v18 }
 0x261   :  { %789 = vrot.lane.b32.xlu1 %v766_v31, %s1023_s1  ;;  %717 = vrot.lane.b32.xlu2 %v694_v32, %s1022_s2 }
 0x268   :  { %v780_v1 = vpop.permute.xlu2 %779 }
 0x269   :  { %785 = vrot.lane.b32.xlu2 %v764_v34, %s1023_s1 }
 0x270   :  { %v776_v43 = vpop.permute.xlu0 %775 }
 0x278   :  { %v778_v33 = vpop.permute.xlu1 %777 }
 0x288   :  { %v782_v48 = vpop.permute.xlu0 %781 }
 0x28b   :  { %v706_v0 = vpop.permute.xlu2 %705 }
 0x28c   :  { %v728_v36 = vadd.f32 %v706_v0, %v680_v24 }
 0x28e   :  { %v1525_v37 = vadd.f32 %v778_v33, %v728_v36 }
 0x290   :  { %1006 = vtanh.f32 %v1525_v37  ;;  %v784_v39 = vpop.permute.xlu1 %783 }
 0x296   :  { %v1007_v40 = vpop.eup %1006 }
 0x297   :  { %825 = vrot.lane.b32.xlu0 %v1007_v40, %s1022_s2 }
 0x29b   :  { %v704_v44 = vpop.permute.xlu1 %703 }
 0x29c   :  { %v727_v45 = vadd.f32 %v704_v44, %v679_v41 }
 0x29e   :  { %v1530_v46 = vadd.f32 %v776_v43, %v727_v45 }
 0x2a0   :  { %1008 = vtanh.f32 %v1530_v46 }
 0x2a3   :  { %v712_v49 = vpop.permute.xlu2 %711 }
 0x2a4   :  { %v731_v50 = vadd.f32 %v712_v49, %v683_v47 }
 0x2a6   :  { %v1009_v51 = vpop.eup %1008  ;;  %v1534_v52 = vadd.f32 %v784_v39, %v731_v50 }
 0x2a7   :  { %823 = vrot.lane.b32.xlu2 %v1009_v51, %s1022_s2 }
 0x2a8   :  { %1010 = vtanh.f32 %v1534_v52 }
 0x2ab   :  { %v708_v54 = vpop.permute.xlu0 %707 }
 0x2ac   :  { %v729_v56 = vadd.f32 %v708_v54, %v681_v53 }
 0x2ae   :  { %v1011_v57 = vpop.eup %1010  ;;  %v1539_v60 = vadd.f32 %v780_v1, %v729_v56 }
 0x2af   :  { %831 = vrot.lane.b32.xlu0 %v1011_v57, %s1022_s2 }
 0x2b0   :  { %1012 = vtanh.f32 %v1539_v60 }
 0x2b3   :  { %v710_v62 = vpop.permute.xlu1 %709 }
 0x2b4   :  { %v730_v63 = vadd.f32 %v710_v62, %v682_v61 }
 0x2b6   :  { %v1013_v8 = vpop.eup %1012  ;;  %v1544_v10 = vadd.f32 %v782_v48, %v730_v63 }
 0x2b7   :  { %827 = vrot.lane.b32.xlu1 %v1013_v8, %s1022_s2 }
 0x2b8   :  { %1014 = vtanh.f32 %v1544_v10 }
 0x2bb   :  { %v718_v11 = vpop.permute.xlu2 %717 }
 0x2bc   :  { %v734_v30 = vadd.f32 %v718_v11, %v686_v29 }
 0x2be   :  { %v1015_v12 = vpop.eup %1014 }
 0x2bf   :  { %829 = vrot.lane.b32.xlu2 %v1015_v12, %s1022_s2 }
 0x2c3   :  { %v714_v15 = vpop.permute.xlu0 %713  ;;  %v786_v16 = vpop.permute.xlu2 %785 }
 0x2c4   :  { %v732_v9 = vadd.f32 %v714_v15, %v684_v14 }
 0x2c6   :  { %v1550_v17 = vadd.f32 %v786_v16, %v732_v9 }
 0x2c8   :  { %1016 = vtanh.f32 %v1550_v17 }
 0x2cb   :  { %v716_v20 = vpop.permute.xlu1 %715  ;;  %v788_v25 = vpop.permute.xlu0 %787 }
 0x2cc   :  { %v733_v21 = vadd.f32 %v716_v20, %v685_v19 }
 0x2ce   :  { %v1017_v26 = vpop.eup %1016  ;;  %v805_v28 = vadd.f32 %v788_v25, %v733_v21 }
 0x2cf   :  { %833 = vrot.lane.b32.xlu1 %v1017_v26, %s1022_s2 }
 0x2d0   :  { %1018 = vtanh.f32 %v805_v28 }
 0x2d3   :  { %v790_v31 = vpop.permute.xlu1 %789 }
 0x2d4   :  { %v806_v32 = vadd.f32 %v790_v31, %v734_v30 }
 0x2d6   :  { %v1019_v7 = vpop.eup %1018  ;;  %1020 = vtanh.f32 %v806_v32 }
 0x2d7   :  { %835 = vrot.lane.b32.xlu2 %v1019_v7, %s1022_s2 }
 0x2dc   :  { %v1021_v34 = vpop.eup %1020 }
 0x2dd   :  { %837 = vrot.lane.b32.xlu0 %v1021_v34, %s1022_s2 }
 0x301   :  { %v824_v35 = vpop.permute.xlu2 %823 }
 0x302   :  { %v847_v3 = vmul.f32 %v824_v35, %v1469_v59 }
 0x304   :  { %863 = vrot.lane.b32.xlu1 %v847_v3, %s1023_s1 }
 0x309   :  { %v826_v4 = vpop.permute.xlu0 %825 }
 0x30a   :  { %v848_v2 = vmul.f32 %v826_v4, %v1473_v22 }
 0x30c   :  { %865 = vrot.lane.b32.xlu2 %v848_v2, %s1023_s1 }
 0x319   :  { %v830_v6 = vpop.permute.xlu2 %829 }
 0x31a   :  { %v850_v23 = vmul.f32 %v830_v6, %v1481_v42 }
 0x31c   :  { %869 = vrot.lane.b32.xlu1 %v850_v23, %s1023_s1 }
 0x321   :  { %v832_v1 = vpop.permute.xlu0 %831 }
 0x322   :  { %v851_v24 = vmul.f32 %v832_v1, %v1485_v55 }
 0x324   :  { %871 = vrot.lane.b32.xlu2 %v851_v24, %s1023_s1 }
 0x329   :  { %v828_v27 = vpop.permute.xlu1 %827 }
 0x32a   :  { %v849_v59 = vmul.f32 %v828_v27, %v1477_v5 }
 0x32c   :  { %867 = vrot.lane.b32.xlu0 %v849_v59, %s1023_s1 }
 0x331   :  { %v836_v33 = vpop.permute.xlu2 %835 }
 0x332   :  { %v853_v22 = vmul.f32 %v836_v33, %v1507_v13 }
 0x334   :  { %875 = vrot.lane.b32.xlu1 %v853_v22, %s1023_s1 }
 0x341   :  { %v834_v0 = vpop.permute.xlu1 %833 }
 0x342   :  { %v852_v42 = vmul.f32 %v834_v0, %v1503_v58 }
 0x344   :  { %873 = vrot.lane.b32.xlu0 %v852_v42, %s1023_s1 }
 0x34f   :  { %v838_v36 = vpop.permute.xlu0 %837 }
 0x350   :  { %v854_v55 = vmul.f32 %v838_v36, %v1516_v18 }
 0x352   :  { %877 = vrot.lane.b32.xlu2 %v854_v55, %s1023_s1 }
 0x366   :  { %v866_v38 = vpop.permute.xlu2 %865 }
 0x367   :  { %v888_v5 = vsel %vm298_vm2, %v866_v38, %v1525_v37 }
 0x368   :  { %896 = vst.msk [vmem:[%s1627_s7 + $0x8] sm:$0xff] %vm42_vm0, %v888_v5 }
 0x376   :  { %v864_v13 = vpop.permute.xlu1 %863 }
 0x377   :  { %v887_v58 = vsel %vm298_vm2, %v864_v13, %v1530_v46 }
 0x378   :  { %895 = vst.msk [vmem:[%s1627_s7] sm:$0xff] %vm42_vm0, %v887_v58 }
 0x37e   :  { %v872_v18 = vpop.permute.xlu2 %871 }
 0x37f   :  { %v891_v39 = vsel %vm298_vm2, %v872_v18, %v1534_v52 }
 0x380   :  { %899 = vst.msk [vmem:[%s1627_s7 + $0x20] sm:$0xff] %vm42_vm0, %v891_v39 }
 0x38e   :  { %v870_v37 = vpop.permute.xlu1 %869 }
 0x38f   :  { %v890_v40 = vsel %vm298_vm2, %v870_v37, %v1544_v10 }
 0x390   :  { %898 = vst.msk [vmem:[%s1627_s7 + $0x18] sm:$0xff] %vm42_vm0, %v890_v40 }
 0x39e   :  { %v868_v41 = vpop.permute.xlu0 %867 }
 0x39f   :  { %v889_v43 = vsel %vm298_vm2, %v868_v41, %v1539_v60 }
 0x3a0   :  { %897 = vst.msk [vmem:[%s1627_s7 + $0x10] sm:$0xff] %vm42_vm0, %v889_v43 }
 0x3a6   :  { %v876_v44 = vpop.permute.xlu1 %875 }
 0x3a7   :  { %v893_v45 = vsel %vm298_vm2, %v876_v44, %v805_v28 }
 0x3a8   :  { %901 = vst.msk [vmem:[%s1627_s7 + $0x30] sm:$0xff] %vm42_vm0, %v893_v45 }
 0x3ac   :  { %v878_v46 = vpop.permute.xlu2 %877 }
 0x3ad   :  { %v894_v47 = vsel %vm298_vm2, %v878_v46, %v806_v32 }
 0x3ae   :  { %902 = vst.msk [vmem:[%s1627_s7 + $0x38] sm:$0xff] %vm42_vm0, %v894_v47 }
 0x3b6   :  { %v874_v48 = vpop.permute.xlu0 %873 }
 0x3b7   :  { %v892_v49 = vsel %vm298_vm2, %v874_v48, %v1550_v17 }
 0x3b8   :  { %900 = vst.msk [vmem:[%s1627_s7 + $0x28] sm:$0xff] %vm42_vm0, %v892_v49 }

</bundles_post_ra>
